<compile_context>
chip_gen: v7x
topology: tpu7x:2x2x1
jax: 0.10.0
libtpu: 0.0.40
codegen_flags: <defaults>
</compile_context>

<pallas_src>
import math
from functools import partial

import jax
import jax.numpy as jnp
from jax.experimental import pallas as pl
from jax.experimental.pallas import tpu as pltpu

# ----------------------------- config (small, deterministic) -----------------------------
BATCH = 2
IN_CH = 3          # RGB, as EfficientNet expects
IMG = 16           # H = W = 16
KH = KW = 3
STRIDE = 2
PAD = 1
OH = OW = (IMG + 2 * PAD - KH) // STRIDE + 1    # 8
HW = OH * OW                                    # 64
ROWS = BATCH * HW                               # 128 im2col rows (b-major)
TAPS = KH * KW * IN_CH                          # 27 im2col columns
C_STEM = 32        # EfficientNet-b0 stem width
FEATURE_DIM = 128  # stands in for b0's 1280-dim pooled feature
NUM_CLASSES = 16
NC_PAD = 128       # lane-dense logits width (sliced back to NUM_CLASSES on host)
ARC_SCALE = 64.0
ARC_MARGIN = 0.5

_VMEM = pl.BlockSpec(memory_space=pltpu.MemorySpace.VMEM)


# ----------------------------- fused kernel bodies -----------------------------
def _stem_pool_fc(im2col_ref, w_ref, shift_ref, pool_ref, headw_ref):
    """Stem conv (im2col MXU dot, folded BN) + SiLU + GAP (pool matmul) + FC.

    im2col_ref: (ROWS, TAPS)        rows = b*HW + oh*OW + ow, cols = tap*C_in + ci
    w_ref     : (TAPS, C_STEM)      BN-scale-folded conv weight
    shift_ref : (1, C_STEM)         folded BN shift
    pool_ref  : (BATCH, ROWS)       block-ones GAP matrix
    headw_ref : (C_STEM, FEATURE_DIM)  FC weight with 1/HW folded in
    returns   : (BATCH, FEATURE_DIM) features (f32 value)
    """
    y = jnp.dot(im2col_ref[...], w_ref[...],
                preferred_element_type=jnp.float32)            # (ROWS, C_STEM)
    y = y + shift_ref[...]                                      # folded BN shift
    y = y * jax.nn.sigmoid(y)                                   # SiLU / Swish
    pooled = jnp.dot(pool_ref[...], y,
                     preferred_element_type=jnp.float32)        # (B, C_STEM) spatial sum
    return jnp.dot(pooled, headw_ref[...],
                   preferred_element_type=jnp.float32)          # (B, FEATURE_DIM)


def _features_kernel(im2col_ref, w_ref, shift_ref, pool_ref, headw_ref, feat_ref):
    feat_ref[...] = _stem_pool_fc(im2col_ref, w_ref, shift_ref, pool_ref, headw_ref)


def _full_kernel(lab_ref, im2col_ref, w_ref, shift_ref, pool_ref, headw_ref, arcwt_ref,
                 feat_ref, logit_ref, *, scale, cos_m, sin_m):
    feats = _stem_pool_fc(im2col_ref, w_ref, shift_ref, pool_ref, headw_ref)
    feat_ref[...] = feats

    # cos_theta = features @ arc_w.T ; arc_w.T pre-transposed + zero-padded on host.
    cos = jnp.dot(feats, arcwt_ref[...],
                  preferred_element_type=jnp.float32)           # (B, NC_PAD)
    cos = jnp.clip(cos, -1.0, 1.0)
    # cos(acos(cos) + m) == cos*cos(m) - sqrt(1 - cos^2)*sin(m)   (theta in [0, pi])
    sin = jnp.sqrt(jnp.maximum(1.0 - cos * cos, 0.0))
    target = cos * cos_m - sin * sin_m

    # one_hot.scatter_(1, labels, 1.0) -> one vectorized compare against (B,1) labels.
    col = jax.lax.broadcasted_iota(jnp.int32, (BATCH, NC_PAD), 1)
    one_hot = col == lab_ref[...]                               # (B, NC_PAD) bool
    logit_ref[...] = jnp.where(one_hot, target, cos) * scale


# ----------------------------- host-side glue -----------------------------
def _im2col(x_nchw):
    """NCHW -> padded NHWC -> (B*OH*OW, KH*KW*C_in) im2col slab.

    Pure layout/strided-slice ops on ~3 KB of data (no compute); row index is
    b*HW + oh*OW + ow (matches the pooling matrix), column is tap*C_in + ci.
    """
    x = jnp.transpose(x_nchw, (0, 2, 3, 1)).astype(jnp.float32)       # NHWC
    xp = jnp.pad(x, ((0, 0), (PAD, PAD), (PAD, PAD), (0, 0)))         # (B, 18, 18, C)
    taps = []
    for kh in range(KH):
        for kw in range(KW):
            taps.append(jax.lax.slice(
                xp,
                (0, kh, kw, 0),
                (BATCH, kh + STRIDE * (OH - 1) + 1, kw + STRIDE * (OW - 1) + 1, IN_CH),
                (1, STRIDE, STRIDE, 1)))                               # (B, OH, OW, C)
    patches = jnp.stack(taps, axis=3)                                  # (B, OH, OW, 9, C)
    return patches.reshape(ROWS, TAPS)                                 # (128, 27)


def _features_call(im2col, w_mat, shift, pool_mat, head_w):
    return pl.pallas_call(
        _features_kernel,
        out_shape=jax.ShapeDtypeStruct((BATCH, FEATURE_DIM), jnp.float32),
        in_specs=[_VMEM] * 5,
        out_specs=_VMEM,
    )(im2col, w_mat, shift, pool_mat, head_w)


def _full_call(labels2d, im2col, w_mat, shift, pool_mat, head_w, arc_wt):
    kernel = partial(_full_kernel, scale=ARC_SCALE,
                     cos_m=math.cos(ARC_MARGIN), sin_m=math.sin(ARC_MARGIN))
    return pl.pallas_call(
        kernel,
        out_shape=(jax.ShapeDtypeStruct((BATCH, FEATURE_DIM), jnp.float32),
                   jax.ShapeDtypeStruct((BATCH, NC_PAD), jnp.float32)),
        in_specs=[_VMEM] * 7,
        out_specs=(_VMEM, _VMEM),
    )(labels2d, im2col, w_mat, shift, pool_mat, head_w, arc_wt)


# ----------------------------- params -----------------------------
def init_params(key):
    k1, k2, k3 = jax.random.split(key, 3)
    fan_in = IN_CH * KH * KW
    # stem conv weight, PyTorch layout (C_out, C_in, KH, KW)
    w_conv = jax.random.normal(k1, (C_STEM, IN_CH, KH, KW), jnp.float32) / math.sqrt(fan_in)
    # folded BatchNorm (gamma/sqrt(var+eps), beta - mean*scale): synthetic values
    bn_scale = jnp.ones((C_STEM,), jnp.float32)
    bn_shift = jnp.zeros((C_STEM,), jnp.float32)
    # head FC: (C_STEM, FEATURE_DIM)
    head_w = jax.random.normal(k2, (C_STEM, FEATURE_DIM), jnp.float32) / math.sqrt(C_STEM)
    # ArcFace weight, xavier_uniform_ with shape (out_features, in_features)
    a = math.sqrt(6.0 / (FEATURE_DIM + NUM_CLASSES))
    arc_w = jax.random.uniform(k3, (NUM_CLASSES, FEATURE_DIM), jnp.float32, -a, a)
    return dict(w_conv=w_conv, bn_scale=bn_scale, bn_shift=bn_shift,
                head_w=head_w, arc_w=arc_w)


def prepare_params(params):
    """One-time constant folding / relayout (done once, outside the hot path)."""
    # BN scale -> conv weight; reorder to im2col column order (tap*C_in + ci, C_STEM).
    w_bn = params["w_conv"] * params["bn_scale"][:, None, None, None]   # (C_STEM, C_in, KH, KW)
    w_mat = jnp.transpose(w_bn, (2, 3, 1, 0)).reshape(TAPS, C_STEM)     # (27, 32)
    shift = params["bn_shift"].reshape(1, C_STEM)
    # Global-average-pool as a block-ones matmul; 1/HW folded into the FC weight.
    pool_mat = jnp.repeat(jnp.eye(BATCH, dtype=jnp.float32), HW, axis=1)  # (B, B*HW)
    head_w = params["head_w"] * (1.0 / HW)                              # (C_STEM, FEATURE_DIM)
    # ArcFace weight: zero-pad classes to NC_PAD and pre-transpose to (F, NC_PAD).
    arc_pad = jnp.zeros((NC_PAD, FEATURE_DIM), jnp.float32).at[:NUM_CLASSES].set(params["arc_w"])
    arc_wt = arc_pad.T                                                   # (FEATURE_DIM, NC_PAD)
    return dict(w_mat=w_mat, shift=shift, pool_mat=pool_mat, head_w=head_w, arc_wt=arc_wt)


# ----------------------------- public forward -----------------------------
@jax.jit
def forward_features(prep, x):
    im2col = _im2col(x)
    return _features_call(im2col, prep["w_mat"], prep["shift"],
                          prep["pool_mat"], prep["head_w"])


@jax.jit
def forward_with_labels(prep, x, labels):
    im2col = _im2col(x)
    labels2d = labels.astype(jnp.int32).reshape(BATCH, 1)
    _, logits = _full_call(labels2d, im2col, prep["w_mat"], prep["shift"],
                           prep["pool_mat"], prep["head_w"], prep["arc_wt"])
    return logits[:, :NUM_CLASSES]        # lane-dense kernel output, sliced to real classes


if __name__ == "__main__":
    key = jax.random.PRNGKey(0)
    kx, kl, kp = jax.random.split(key, 3)
    x = jax.random.normal(kx, (BATCH, IN_CH, IMG, IMG), jnp.float32)    # NCHW, like PyTorch
    labels = jax.random.randint(kl, (BATCH,), 0, NUM_CLASSES, jnp.int32)
    prep = prepare_params(init_params(kp))

    feats = forward_features(prep, x)
    logits = forward_with_labels(prep, x, labels)
    jax.block_until_ready((feats, logits))

    assert feats.shape == (BATCH, FEATURE_DIM)
    assert logits.shape == (BATCH, NUM_CLASSES)
    print("KERNEL_OK")
</pallas_src>

<mosaic_0001>
module attributes {stable_mosaic.version = 11 : i64} {
  func.func @_features_kernel(%arg0: memref<128x27xf32, #tpu.memory_space<vmem>>, %arg1: memref<27x32xf32, #tpu.memory_space<vmem>>, %arg2: memref<1x32xf32, #tpu.memory_space<vmem>>, %arg3: memref<2x128xf32, #tpu.memory_space<vmem>>, %arg4: memref<32x128xf32, #tpu.memory_space<vmem>>, %arg5: memref<2x128xf32, #tpu.memory_space<vmem>>) attributes {dimension_semantics = [], scalar_prefetch = 0 : i64, scratch_operands = 0 : i64, tpu.core_type = #tpu.core_type<tc>} {
    %c0 = arith.constant 0 : index
    %c0_0 = arith.constant 0 : index
    %0 = vector.load %arg0[%c0, %c0_0] : memref<128x27xf32, #tpu.memory_space<vmem>>, vector<128x27xf32>
    %c0_1 = arith.constant 0 : index
    %c0_2 = arith.constant 0 : index
    %1 = vector.load %arg1[%c0_1, %c0_2] : memref<27x32xf32, #tpu.memory_space<vmem>>, vector<27x32xf32>
    %cst = arith.constant dense<0.000000e+00> : vector<128x32xf32>
    %2 = tpu.matmul %0, %1, %cst {dimension_numbers = #tpu.dot_dimension_numbers<[1], [0], [0], [1], [0, 0, 1, 1], [], []>} : vector<128x27xf32>, vector<27x32xf32>, vector<128x32xf32> -> vector<128x32xf32>
    %c0_3 = arith.constant 0 : index
    %c0_4 = arith.constant 0 : index
    %3 = vector.load %arg2[%c0_3, %c0_4] : memref<1x32xf32, #tpu.memory_space<vmem>>, vector<1x32xf32>
    %4 = vector.broadcast %3 : vector<1x32xf32> to vector<128x32xf32>
    %5 = arith.addf %2, %4 : vector<128x32xf32>
    %6 = arith.negf %5 : vector<128x32xf32>
    %7 = math.exp %6 : vector<128x32xf32>
    %cst_5 = arith.constant 1.000000e+00 : f32
    %8 = vector.broadcast %cst_5 : f32 to vector<128x32xf32>
    %9 = arith.addf %8, %7 : vector<128x32xf32>
    %10 = arith.divf %8, %9 : vector<128x32xf32>
    %11 = arith.mulf %5, %10 : vector<128x32xf32>
    %c0_6 = arith.constant 0 : index
    %c0_7 = arith.constant 0 : index
    %12 = vector.load %arg3[%c0_6, %c0_7] : memref<2x128xf32, #tpu.memory_space<vmem>>, vector<2x128xf32>
    %cst_8 = arith.constant dense<0.000000e+00> : vector<2x32xf32>
    %13 = tpu.matmul %12, %11, %cst_8 {dimension_numbers = #tpu.dot_dimension_numbers<[1], [0], [0], [1], [0, 0, 1, 1], [], []>} : vector<2x128xf32>, vector<128x32xf32>, vector<2x32xf32> -> vector<2x32xf32>
    %c0_9 = arith.constant 0 : index
    %c0_10 = arith.constant 0 : index
    %14 = vector.load %arg4[%c0_9, %c0_10] : memref<32x128xf32, #tpu.memory_space<vmem>>, vector<32x128xf32>
    %cst_11 = arith.constant dense<0.000000e+00> : vector<2x128xf32>
    %15 = tpu.matmul %13, %14, %cst_11 {dimension_numbers = #tpu.dot_dimension_numbers<[1], [0], [0], [1], [0, 0, 1, 1], [], []>} : vector<2x32xf32>, vector<32x128xf32>, vector<2x128xf32> -> vector<2x128xf32>
    %c0_12 = arith.constant 0 : index
    %c0_13 = arith.constant 0 : index
    %16 = vector.load %arg5[%c0_12, %c0_13] : memref<2x128xf32, #tpu.memory_space<vmem>>, vector<2x128xf32>
    tpu.vector_store %arg5[%c0_12, %c0_13], %15 {strides = array<i32>} : memref<2x128xf32, #tpu.memory_space<vmem>>, vector<2x128xf32>,
    return
  }
}

</mosaic_0001>

<bundles_post_ra>
// kernel: forward_features.1
= control target key start
LH: loop header
LB: loop body
LE: loop exit
PB: predicated region body
PF: predicated region fallthrough
CT: control target
= control target key end

     0   :  { %vm97_vm0 = vcmask 1042432   ;;  %vm48_vm1 = vcmask 220160   ;;  %vm810_vm2 = vmmov 1   ;;  %s1043_s0 = inlined_call_operand.vmem [shape: f32[128,27], index: 0, kind: input, shape index: {}]   ;;  %s1044_s1 = inlined_call_operand.vmem [shape: f32[27,32], index: 1, kind: input, shape index: {}]   ;;  %s1045_s2 = inlined_call_operand.vmem [shape: f32[1,32], index: 2, kind: input, shape index: {}]   ;;  %s1046_s3 = inlined_call_operand.vmem [shape: f32[2,128], index: 3, kind: input, shape index: {}]   ;;  %s1047_s4 = inlined_call_operand.vmem [shape: f32[32,128], index: 4, kind: input, shape index: {}]   ;;  %s1048_s5 = inlined_call_operand.hbm [shape: f32[2,128], index: 5, kind: output, shape index: {}]  }
   0x1   :  { %v37_v0 = vld [vmem:[%s1044_s1] sm:$0xff]  ;;  %v38_v1 = vld [vmem:[%s1044_s1 + $0x8] sm:$0xff]  ;;  %v39_v2 = vld [vmem:[%s1044_s1 + $0x10] sm:$0xff] }
   0x2   :  { %v677_v3 = vpack.c.bf16 %v38_v1, %v37_v0  ;;  %v40_v4 = vld [vmem:[%s1044_s1 + $0x18] sm:$0x7]  ;;  %v21_v5 = vld [vmem:[%s1043_s0] sm:$0xff]  ;;  %vm682_vm3 = vmpackc.low %vm97_vm0, %vm810_vm2 }
   0x3   :  { %v681_v6 = vpack.c.bf16 %v40_v4, %v39_v2  ;;  %607 = vmatprep.mubr.msk.f32.mxu0 %vm48_vm1, %v21_v5 }
   0x4   :  { %678 = vmatprep.subr.bf16.mxu0 %v677_v3 }
   0x5   :  { %680 = vmatpush3.bf16.msra.mxu0 %v677_v3 }
   0x6   :  { %683 = vmatprep.subr.msk.bf16.mxu0 %vm682_vm3, %v681_v6 }
   0x7   :  { %10 = vsyncpa [#allocation3], 0  ;;  %v22_v7 = vld [vmem:[%s1043_s0 + $0x8] sm:$0xff]  ;;  %v23_v8 = vld [vmem:[%s1043_s0 + $0x10] sm:$0xff]  ;;  %v811_v22 = vmov 0.0|0.0   ;;  %vm812_vm4 = vmmov 0  }
   0x8   :  { %v24_v9 = vld [vmem:[%s1043_s0 + $0x18] sm:$0xff]  ;;  %v25_v10 = vld [vmem:[%s1043_s0 + $0x20] sm:$0xff]  ;;  %v26_v11 = vld [vmem:[%s1043_s0 + $0x28] sm:$0xff]  ;;  %687 = vmatprep.subr.bf16.mxu1 %v811_v22  ;;  %v813_v23 = vmov 0.0   ;;  %vm433_vm5 = vcmask 261120   ;;  %s814_s15 = smov [#allocation2]  }
   0x9   :  { %686 = vmatpush3.bf16.msk.msra.mxu0 %vm682_vm3, %v681_v6  ;;  %v27_v12 = vld [vmem:[%s1043_s0 + $0x30] sm:$0xff]  ;;  %v28_v13 = vld [vmem:[%s1043_s0 + $0x38] sm:$0xff]  ;;  %v29_v14 = vld [vmem:[%s1043_s0 + $0x40] sm:$0xff]  ;;  %663 = vmatprep.mubr.msk.f32.mxu1 %vm812_vm4, %v813_v23  ;;  %s514_s16 = sshll.u32 %s814_s15, 4  ;;  %s515_s16 = int_to_ptr.vmem [resolvable:$true] %s514_s16 }
   0xa   :  { %v30_v15 = vld [vmem:[%s1043_s0 + $0x48] sm:$0xff]  ;;  %v31_v16 = vld [vmem:[%s1043_s0 + $0x50] sm:$0xff]  ;;  %v32_v17 = vld [vmem:[%s1043_s0 + $0x58] sm:$0xff]  ;;  %711 = vmatprep.subr.bf16.mxu0 %v811_v22  ;;  %s786_s17 = scalar_lea.vmem %s515_s16, 32  ;;  %p791_p1 = scmp.lt.s32.totalorder %s515_s16, %s515_s16 }
   0xb   :  { %v33_v18 = vld [vmem:[%s1043_s0 + $0x60] sm:$0xff]  ;;  %v34_v19 = vld [vmem:[%s1043_s0 + $0x68] sm:$0xff]  ;;  %v35_v20 = vld [vmem:[%s1043_s0 + $0x70] sm:$0xff]  ;;  %p787_p0 = scmp.ne.s32.totalorder %s515_s16, %s786_s17  ;;  %p792_p2 = scmp.lt.s32.totalorder %s786_s17, %s786_s17 }
   0xc   :  { %608 = vmatmul.mubr.msk.f32.vlgmr.msra.gmra.mrb[0].mxu0 %vm48_vm1, %v22_v7  ;;  %v36_v21 = vld [vmem:[%s1043_s0 + $0x78] sm:$0xff]  ;;  %v429_v24 = vld [vmem:[%s1047_s4] sm:$0xff]  ;;  %v430_v25 = vld [vmem:[%s1047_s4 + $0x8] sm:$0xff] }
   0xd   :  { %610 = vmatprep.mubr.msk.f32.mxu0 %vm48_vm1, %v23_v8  ;;  %v431_v26 = vld [vmem:[%s1047_s4 + $0x10] sm:$0xff]  ;;  %v712_v27 = vpack.c.bf16 %v430_v25, %v429_v24  ;;  %v432_v28 = vld [vmem:[%s1047_s4 + $0x18] sm:$0xff]  ;;  %v939_v30 = vld [vmem:[%s1045_s2] ss:$0 sm:$0xff]  ;;  %p793_p3 = por %p792_p2, %p791_p1 }
   0xe   :  { %v715_v29 = vpack.c.bf16 %v432_v28, %v431_v26 }
   0xf   :  { %713 = vmatpush3.bf16.msra.mxu0 %v712_v27  ;;  %p794_p4 = pnand %p793_p3, %p787_p0 }
  0x10   :  { %611 = vmatmul.mubr.msk.f32.gmra.mrb[2].mxu0 %vm48_vm1, %v24_v9  ;;  %714 = vmatprep.subr.bf16.mxu0 %v811_v22 }
  0x11   :  { %613 = vmatprep.mubr.msk.f32.mxu0 %vm48_vm1, %v25_v10 }
  0x13   :  { %716 = vmatpush3.bf16.msra.mxu0 %v715_v29 }
  0x14   :  { %614 = vmatmul.mubr.msk.f32.gmra.mrb[4].mxu0 %vm48_vm1, %v26_v11 }
  0x15   :  { %616 = vmatprep.mubr.msk.f32.mxu0 %vm48_vm1, %v27_v12 }
  0x18   :  { %617 = vmatmul.mubr.msk.f32.gmra.mrb[6].mxu0 %vm48_vm1, %v28_v13 }
  0x19   :  { %619 = vmatprep.mubr.msk.f32.mxu0 %vm48_vm1, %v29_v14 }
  0x1c   :  { %620 = vmatmul.mubr.msk.f32.gmra.mrb[8].mxu0 %vm48_vm1, %v30_v15 }
  0x1d   :  { %622 = vmatprep.mubr.msk.f32.mxu0 %vm48_vm1, %v31_v16 }
  0x20   :  { %623 = vmatmul.mubr.msk.f32.gmra.mrb[10].mxu0 %vm48_vm1, %v32_v17 }
  0x21   :  { %625 = vmatprep.mubr.msk.f32.mxu0 %vm48_vm1, %v33_v18 }
  0x24   :  { %626 = vmatmul.mubr.msk.f32.gmra.mrb[12].mxu0 %vm48_vm1, %v34_v19 }
  0x25   :  { %628 = vmatprep.mubr.msk.f32.mxu0 %vm48_vm1, %v35_v20 }
  0x28   :  { %629 = vmatmul.mubr.msk.f32.gmra.mrb[14].mxu0 %vm48_vm1, %v36_v21 }
  0x29   :  { %674 = vmatprep.mubr.msk.f32.mxu0 %vm812_vm4, %v813_v23 }
  0xdf   :  { %v609_v31 = vpop.f32.mrb[0].mxu0 }
  0xe0   :  { %v942_v32 = vadd.f32 %v609_v31, %v939_v30  ;;  %v167_v33 = vpop.f32.mrb[1].mxu0 }
  0xe1   :  { %v945_v34 = vadd.f32 %v939_v30, %v167_v33 }
  0xe2   :  { %v541_v35 = vmul.f32 -1.442695, %v942_v32 }
  0xe3   :  { %v540_v36 = vmul.f32 -1.442695, %v945_v34  ;;  %v612_v37 = vpop.f32.mrb[2].mxu0 }
  0xe4   :  { %722 = vpow2.f32 %v541_v35  ;;  %v950_v38 = vadd.f32 %v612_v37, %v939_v30  ;;  %v177_v39 = vpop.f32.mrb[3].mxu0 }
  0xe5   :  { %724 = vpow2.f32 %v540_v36  ;;  %v953_v40 = vadd.f32 %v939_v30, %v177_v39 }
  0xe6   :  { %v543_v41 = vmul.f32 -1.442695, %v950_v38 }
  0xe7   :  { %v542_v42 = vmul.f32 -1.442695, %v953_v40  ;;  %v615_v43 = vpop.f32.mrb[4].mxu0 }
  0xe8   :  { %726 = vpow2.f32 %v543_v41  ;;  %v958_v44 = vadd.f32 %v615_v43, %v939_v30  ;;  %v187_v45 = vpop.f32.mrb[5].mxu0 }
  0xe9   :  { %728 = vpow2.f32 %v542_v42  ;;  %v961_v46 = vadd.f32 %v939_v30, %v187_v45 }
  0xea   :  { %v545_v47 = vmul.f32 -1.442695, %v958_v44 }
  0xeb   :  { %v544_v48 = vmul.f32 -1.442695, %v961_v46  ;;  %v618_v49 = vpop.f32.mrb[6].mxu0 }
  0xec   :  { %730 = vpow2.f32 %v545_v47  ;;  %v966_v50 = vadd.f32 %v618_v49, %v939_v30  ;;  %v197_v51 = vpop.f32.mrb[7].mxu0 }
  0xed   :  { %732 = vpow2.f32 %v544_v48  ;;  %v969_v52 = vadd.f32 %v939_v30, %v197_v51 }
  0xee   :  { %v723_v53 = vpop.eup %722  ;;  %v547_v54 = vmul.f32 -1.442695, %v966_v50 }
  0xef   :  { %v725_v55 = vpop.eup %724  ;;  %v295_v56 = vadd.f32 1.0, %v723_v53  ;;  %v546_v57 = vmul.f32 -1.442695, %v969_v52  ;;  %v621_v58 = vpop.f32.mrb[8].mxu0 }
  0xf0   :  { %v294_v59 = vadd.f32 1.0, %v725_v55  ;;  %734 = vpow2.f32 %v547_v54  ;;  %v974_v60 = vadd.f32 %v621_v58, %v939_v30  ;;  %v207_v61 = vpop.f32.mrb[9].mxu0 }
  0xf1   :  { %736 = vrcp.f32 %v295_v56  ;;  %v977_v62 = vadd.f32 %v939_v30, %v207_v61 }
  0xf2   :  { %v727_v63 = vpop.eup %726  ;;  %738 = vrcp.f32 %v294_v59  ;;  %v549_v0 = vmul.f32 -1.442695, %v974_v60 }
  0xf3   :  { %v729_v1 = vpop.eup %728  ;;  %v297_v2 = vadd.f32 1.0, %v727_v63  ;;  %740 = vpow2.f32 %v546_v57  ;;  %v548_v3 = vmul.f32 -1.442695, %v977_v62  ;;  %v624_v4 = vpop.f32.mrb[10].mxu0 }
  0xf4   :  { %v296_v5 = vadd.f32 1.0, %v729_v1  ;;  %742 = vpow2.f32 %v549_v0  ;;  %v982_v6 = vadd.f32 %v624_v4, %v939_v30  ;;  %v217_v7 = vpop.f32.mrb[11].mxu0 }
  0xf5   :  { %744 = vrcp.f32 %v297_v2  ;;  %v985_v8 = vadd.f32 %v939_v30, %v217_v7 }
  0xf6   :  { %v731_v9 = vpop.eup %730  ;;  %746 = vrcp.f32 %v296_v5  ;;  %v551_v10 = vmul.f32 -1.442695, %v982_v6 }
  0xf7   :  { %v733_v11 = vpop.eup %732  ;;  %v299_v12 = vadd.f32 1.0, %v731_v9  ;;  %748 = vpow2.f32 %v548_v3  ;;  %v550_v13 = vmul.f32 -1.442695, %v985_v8  ;;  %v627_v14 = vpop.f32.mrb[12].mxu0 }
  0xf8   :  { %v298_v15 = vadd.f32 1.0, %v733_v11  ;;  %750 = vpow2.f32 %v551_v10  ;;  %v990_v16 = vadd.f32 %v627_v14, %v939_v30  ;;  %v227_v17 = vpop.f32.mrb[13].mxu0 }
  0xf9   :  { %752 = vrcp.f32 %v299_v12  ;;  %v993_v18 = vadd.f32 %v939_v30, %v227_v17 }
  0xfa   :  { %v735_v19 = vpop.eup %734  ;;  %754 = vrcp.f32 %v298_v15  ;;  %v553_v20 = vmul.f32 -1.442695, %v990_v16 }
  0xfb   :  { %v737_v21 = vpop.eup %736  ;;  %v301_v23 = vadd.f32 1.0, %v735_v19  ;;  %756 = vpow2.f32 %v550_v13  ;;  %v552_v24 = vmul.f32 -1.442695, %v993_v18  ;;  %v630_v25 = vpop.f32.mrb[14].mxu0 }
  0xfc   :  { %v739_v26 = vpop.eup %738  ;;  %v343_v27 = vmul.f32 %v737_v21, %v942_v32  ;;  %758 = vpow2.f32 %v553_v20  ;;  %v999_v28 = vadd.f32 %v630_v25, %v939_v30  ;;  %v237_v29 = vpop.f32.mrb[15].mxu0 }
  0xfd   :  { %v741_v31 = vpop.eup %740  ;;  %v342_v33 = vmul.f32 %v739_v26, %v945_v34  ;;  %760 = vrcp.f32 %v301_v23  ;;  %v1003_v35 = vadd.f32 %v939_v30, %v237_v29 }
  0xfe   :  { %v743_v36 = vpop.eup %742  ;;  %v300_v37 = vadd.f32 1.0, %v741_v31  ;;  %762 = vpow2.f32 %v552_v24  ;;  %v555_v39 = vmul.f32 -1.442695, %v999_v28 }
  0xff   :  { %v745_v41 = vpop.eup %744  ;;  %v303_v42 = vadd.f32 1.0, %v743_v36  ;;  %v554_v32 = vmul.f32 -1.442695, %v1003_v35  ;;  %v688_v43 = vpack.c.bf16 %v343_v27, %v342_v33 }
 0x100   :  { %v747_v45 = vpop.eup %746  ;;  %v345_v47 = vmul.f32 %v745_v41, %v950_v38  ;;  %764 = vrcp.f32 %v300_v37 }
 0x101   :  { %v749_v48 = vpop.eup %748  ;;  %v344_v34 = vmul.f32 %v747_v45, %v953_v40  ;;  %766 = vrcp.f32 %v303_v42  ;;  %689 = vmatpush3.bf16.msra.mxu1 %v688_v43 }
 0x102   :  { %v751_v30 = vpop.eup %750  ;;  %v302_v49 = vadd.f32 1.0, %v749_v48  ;;  %768 = vpow2.f32 %v555_v39  ;;  %690 = vmatprep.subr.bf16.mxu1 %v811_v22 }
 0x103   :  { %v753_v51 = vpop.eup %752  ;;  %v305_v53 = vadd.f32 1.0, %v751_v30  ;;  %770 = vpow2.f32 %v554_v32  ;;  %v691_v54 = vpack.c.bf16 %v345_v47, %v344_v34 }
 0x104   :  { %v755_v55 = vpop.eup %754  ;;  %v347_v56 = vmul.f32 %v753_v51, %v958_v44  ;;  %772 = vrcp.f32 %v302_v49 }
 0x105   :  { %v757_v38 = vpop.eup %756  ;;  %v346_v57 = vmul.f32 %v755_v55, %v961_v46  ;;  %774 = vrcp.f32 %v305_v53  ;;  %692 = vmatpush3.bf16.msra.mxu1 %v691_v54 }
 0x106   :  { %v759_v40 = vpop.eup %758  ;;  %v304_v58 = vadd.f32 1.0, %v757_v38  ;;  %693 = vmatprep.subr.bf16.mxu1 %v811_v22 }
 0x107   :  { %v761_v59 = vpop.eup %760  ;;  %v307_v61 = vadd.f32 1.0, %v759_v40  ;;  %v694_v63 = vpack.c.bf16 %v347_v56, %v346_v57 }
 0x108   :  { %v763_v0 = vpop.eup %762  ;;  %776 = vrcp.f32 %v304_v58  ;;  %v349_v1 = vmul.f32 %v761_v59, %v966_v50 }
 0x109   :  { %778 = vrcp.f32 %v307_v61  ;;  %v306_v2 = vadd.f32 1.0, %v763_v0  ;;  %695 = vmatpush3.bf16.msra.mxu1 %v694_v63 }
 0x10a   :  { %v765_v44 = vpop.eup %764  ;;  %696 = vmatprep.subr.bf16.mxu1 %v811_v22 }
 0x10b   :  { %v767_v46 = vpop.eup %766  ;;  %v348_v3 = vmul.f32 %v765_v44, %v969_v52  ;;  %780 = vrcp.f32 %v306_v2 }
 0x10c   :  { %v769_v4 = vpop.eup %768  ;;  %v351_v7 = vmul.f32 %v767_v46, %v974_v60 }
 0x10d   :  { %v771_v5 = vpop.eup %770  ;;  %v309_v9 = vadd.f32 1.0, %v769_v4  ;;  %v697_v10 = vpack.c.bf16 %v349_v1, %v348_v3 }
 0x10e   :  { %v773_v11 = vpop.eup %772  ;;  %v308_v12 = vadd.f32 1.0, %v771_v5 }
 0x10f   :  { %v775_v13 = vpop.eup %774  ;;  %v350_v50 = vmul.f32 %v773_v11, %v977_v62  ;;  %782 = vrcp.f32 %v309_v9  ;;  %698 = vmatpush3.bf16.msra.mxu1 %v697_v10 }
 0x110   :  { %784 = vrcp.f32 %v308_v12  ;;  %699 = vmatprep.subr.bf16.mxu1 %v811_v22  ;;  %v353_v14 = vmul.f32 %v775_v13, %v982_v6 }
 0x111   :  { %v700_v52 = vpack.c.bf16 %v351_v7, %v350_v50 }
 0x112   :  { %v777_v15 = vpop.eup %776 }
 0x113   :  { %v779_v17 = vpop.eup %778  ;;  %v352_v19 = vmul.f32 %v777_v15, %v985_v8  ;;  %701 = vmatpush3.bf16.msra.mxu1 %v700_v52 }
 0x114   :  { %v355_v60 = vmul.f32 %v779_v17, %v990_v16  ;;  %702 = vmatprep.subr.bf16.mxu1 %v811_v22  ;;  %v358_v16 = vld [vmem:[%s1046_s3] sm:$0x3] }
 0x115   :  { %v781_v20 = vpop.eup %780  ;;  %v703_v21 = vpack.c.bf16 %v353_v14, %v352_v19 }
 0x116   :  { %v354_v62 = vmul.f32 %v781_v20, %v993_v18 }
 0x117   :  { %704 = vmatpush3.bf16.msra.mxu1 %v703_v21 }
 0x118   :  { %705 = vmatprep.subr.bf16.mxu1 %v811_v22  ;;  %v706_v23 = vpack.c.bf16 %v355_v60, %v354_v62 }
 0x119   :  { %v783_v24 = vpop.eup %782 }
 0x11a   :  { %v785_v6 = vpop.eup %784  ;;  %v357_v25 = vmul.f32 %v783_v24, %v999_v28 }
 0x11b   :  { %v356_v26 = vmul.f32 %v785_v6, %v1003_v35  ;;  %707 = vmatpush3.bf16.msra.mxu1 %v706_v23 }
 0x11c   :  { %708 = vmatprep.subr.bf16.mxu1 %v811_v22 }
 0x11d   :  { %v709_v8 = vpack.c.bf16 %v357_v25, %v356_v26 }
 0x11f   :  { %710 = vmatpush3.bf16.msra.mxu1 %v709_v8 }
 0x122   :  { %664 = vmatmul.mubr.f32.vlgmr.msra.gmra.mrb[0].mxu1 %v358_v16 }
 0x1f5   :  { %v425_v18 = vpop.f32.mrb[0].mxu1 }
 0x1f6   :  { %v665_v27 = vpop.f32.mrb[1].mxu1  ;;  %675 = vmatmul.mubr.msk.f32.vlgmr.msra.gmra.mrb[16].mxu0 %vm433_vm5, %v425_v18 }
 0x2c9   :  { %v503_v28 = vpop.f32.mrb[16].mxu0 }
 0x2ca   :  { %507 = vst [vmem:[#allocation2] sm:$0x3] %v503_v28  ;;  %v676_v29 = vpop.f32.mrb[17].mxu0 }
 0x2cb   :  { %797 = shalt.err (!%p794_p4)
}
 0x2cc   :  { %s798_s19 = scalar_lea.hbm %s1048_s5, 32 }
 0x2cd   :  { %p799_p5 = scmp.ne.s32.totalorder %s1048_s5, %s798_s19  ;;  %p802_p6 = scmp.lt.u32.totalorder %s798_s19, %s1048_s5 }
 0x2cf   :  { %p804_p7 = pnand %p802_p6, %p799_p5 }
 0x2d1   :  { %807 = shalt.err (!%p804_p7)
}
 0x2d2   :  { %517 = dma.vmem_to_hbm [thread:$0]  %s515_s16, 32, %s1048_s5, [#allocation3]  }
 0x2d3   :  { %808 = dma.done.wait [#allocation3], 32  }
 0x2d4   :  { %809 = vsyncadd [#allocation3], 4294967264 }
 0x2d5   :  { %521 = vsyncpa [#allocation3], 1 }

</bundles_post_ra>
